<compile_context>
chip_gen: v5e
topology: v5e:2x2
jax: 0.10.0
libtpu: 0.0.40
codegen_flags: <defaults>
</compile_context>

<pallas_src>
import functools

import jax
import jax.numpy as jnp
from jax.experimental import pallas as pl
from jax.experimental.pallas import tpu as pltpu


def _round_up(x, m):
    return ((x + m - 1) // m) * m


@functools.lru_cache(maxsize=None)
def _vmem_capacity_bytes():
    try:
        return int(pltpu.get_tpu_info().vmem_capacity_bytes)
    except Exception:
        return 64 * 1024 * 1024  # conservative fallback: v7x per-TC VMEM


def _make_kernel(hw, tk, num_k, lane_path):
    inv_hw = 1.0 / float(hw)
    rem = hw - (num_k - 1) * tk  # valid lanes in the final spatial block (static)

    def mlp_and_store(w1_ref, b1_ref, w2_ref, b2_ref, y_ref, avg1, avg2, mx1, mx2):
        # feat = [avg1 | avg2 | max1 | max2] @ W1 done as four accumulated matmuls
        # against the sublane-aligned (dim, hidden_p) slabs of the (4, dim, hidden_p)
        # weight — no lane-axis concat, no cross-sublane relayout.
        h = jnp.dot(avg1, w1_ref[0], preferred_element_type=jnp.float32)
        h = h + jnp.dot(avg2, w1_ref[1], preferred_element_type=jnp.float32)
        h = h + jnp.dot(mx1, w1_ref[2], preferred_element_type=jnp.float32)
        h = h + jnp.dot(mx2, w1_ref[3], preferred_element_type=jnp.float32)
        h = jnp.maximum(h + b1_ref[...], 0.0)
        y = jnp.dot(h, w2_ref[...], preferred_element_type=jnp.float32)
        y = jax.nn.sigmoid(y + b2_ref[...])
        y_ref[...] = y[:, None, :].astype(y_ref.dtype)

    if lane_path:
        n_slices = tk // 128

        def kernel(x1_ref, x2_ref, w1_ref, b1_ref, w2_ref, b2_ref, y_ref,
                   sum1, sum2, max1, max2):
            k = pl.program_id(1)

            @pl.when(k == 0)
            def _init():
                sum1[...] = jnp.zeros_like(sum1)
                sum2[...] = jnp.zeros_like(sum2)
                max1[...] = jnp.full_like(max1, -jnp.inf)
                max2[...] = jnp.full_like(max2, -jnp.inf)

            def load(j):
                sl = pl.ds(j * 128, 128)
                return (x1_ref[:, :, sl].astype(jnp.float32),
                        x2_ref[:, :, sl].astype(jnp.float32))

            def accum_one(j, mask_len=None):
                a1, a2 = load(j)
                if mask_len is None:
                    s1, s2, m1, m2 = a1, a2, a1, a2
                else:
                    lane = jax.lax.broadcasted_iota(jnp.int32, a1.shape, 2)
                    valid = lane < mask_len
                    s1 = jnp.where(valid, a1, 0.0)
                    s2 = jnp.where(valid, a2, 0.0)
                    m1 = jnp.where(valid, a1, -jnp.inf)
                    m2 = jnp.where(valid, a2, -jnp.inf)
                sum1[...] += s1
                sum2[...] += s2
                max1[...] = jnp.maximum(max1[...], m1)
                max2[...] = jnp.maximum(max2[...], m2)

            def accum_pair(j):
                # Combine two 128-lane slices before touching scratch: halves the
                # accumulator load/store traffic so vst never outruns HBM (bf16).
                a1_0, a2_0 = load(j)
                a1_1, a2_1 = load(j + 1)
                sum1[...] += a1_0 + a1_1
                sum2[...] += a2_0 + a2_1
                max1[...] = jnp.maximum(max1[...], jnp.maximum(a1_0, a1_1))
                max2[...] = jnp.maximum(max2[...], jnp.maximum(a2_0, a2_1))

            def accum_full_block():
                for j in range(0, (n_slices // 2) * 2, 2):
                    accum_pair(j)
                if n_slices % 2:
                    accum_one(n_slices - 1)

            if rem == tk:
                # No ragged tail: unmasked hot loop on every spatial step.
                accum_full_block()
            else:
                @pl.when(k < num_k - 1)
                def _hot():
                    accum_full_block()

                @pl.when(k == num_k - 1)
                def _tail():
                    # Only the final spatial step pays any masking; the mask
                    # length is a compile-time constant here.
                    n_full = rem // 128
                    for j in range(n_full):
                        accum_one(j)
                    if rem % 128 != 0:
                        accum_one(n_full, mask_len=rem - n_full * 128)

            @pl.when(k == num_k - 1)
            def _finalize():
                mlp_and_store(
                    w1_ref, b1_ref, w2_ref, b2_ref, y_ref,
                    jnp.sum(sum1[...], axis=-1) * inv_hw,
                    jnp.sum(sum2[...], axis=-1) * inv_hw,
                    jnp.max(max1[...], axis=-1),
                    jnp.max(max2[...], axis=-1))

        return kernel

    # Single-step fallback: whole spatial extent fits in one block and is not a
    # multiple of 128 (or < 128) — reduce it directly, no scratch needed.
    def kernel(x1_ref, x2_ref, w1_ref, b1_ref, w2_ref, b2_ref, y_ref):
        x1 = x1_ref[...].astype(jnp.float32)
        x2 = x2_ref[...].astype(jnp.float32)
        mlp_and_store(
            w1_ref, b1_ref, w2_ref, b2_ref, y_ref,
            jnp.sum(x1, axis=-1) * inv_hw,
            jnp.sum(x2, axis=-1) * inv_hw,
            jnp.max(x1, axis=-1),
            jnp.max(x2, axis=-1))

    return kernel


@functools.partial(jax.jit, static_argnames=("dim",))
def channel_weights(x1, x2, w1, b1, w2, b2, *, dim):
    """Pallas implementation of ChannelWeights.forward.

    x1, x2: (B, dim, H, W) NCHW activations (f32 or bf16).
    w1: (4*dim, hidden), b1: (hidden,)   [pre-transposed: x @ w1 + b1]
    w2: (hidden, 2*dim), b2: (2*dim,)
    Returns: (2, B, dim, 1, 1) float32.
    """
    B, C, H, W = x1.shape
    assert C == dim
    assert w1.shape[0] == 4 * dim
    HW = H * W
    hidden = w1.shape[1]
    out2 = 2 * dim

    # Lane-dense padding for the MLP dims (zeros -> numerically inert).
    hidden_p = _round_up(hidden, 128)
    out2_p = _round_up(out2, 128)
    w1p = jnp.pad(w1.astype(jnp.float32), ((0, 0), (0, hidden_p - hidden)))
    # (4*dim, hidden_p) -> (4, dim, hidden_p): each of the four feature blocks
    # [avg1 | avg2 | max1 | max2] becomes its own sublane-aligned slab.
    w1p = w1p.reshape(4, dim, hidden_p)
    b1p = jnp.pad(b1.astype(jnp.float32), (0, hidden_p - hidden)).reshape(1, hidden_p)
    w2p = jnp.pad(w2.astype(jnp.float32),
                  ((0, hidden_p - hidden), (0, out2_p - out2)))
    b2p = jnp.pad(b2.astype(jnp.float32), (0, out2_p - out2)).reshape(1, out2_p)

    # Stream activations in their native dtype; upcast happens inside the kernel.
    x1f = x1.reshape(B, dim, HW)
    x2f = x2.reshape(B, dim, HW)
    itemsize = jnp.dtype(x1f.dtype).itemsize

    # ---- VMEM budget (generation-aware, resident weights accounted) ----------
    vmem_cap = _vmem_capacity_bytes()
    usable = min(int(vmem_cap * 0.75), vmem_cap - (16 << 20))
    usable = max(usable, 32 << 20)
    weight_bytes = 4 * (w1p.size + b1p.size + w2p.size + b2p.size)
    # Weight/bias specs have constant index maps but are still double-buffered by
    # the pipeline, so budget 2x for them (plus slack for scratch/output/temps).
    input_budget = max(usable - 2 * weight_bytes - (4 << 20), 4 << 20)

    # ---- batch tile -----------------------------------------------------------
    # Largest divisor of B up to 8 (amortizes the ~0.35us grid-step overhead and
    # gives the epilogue matmul M=TB), keeping >= 2 batch tiles when B >= 2 so the
    # "parallel" axis can still split across v7x's two TensorCores.
    cap = min(8, B if B < 2 else max(1, B // 2))
    cands = [t for t in range(cap, 0, -1) if B % t == 0]
    TB = cands[-1]
    for t in cands:
        if 4 * t * dim * itemsize * 128 <= input_budget:  # 128-lane window fits
            TB = t
            break

    # ---- spatial tile ---------------------------------------------------------
    per_lane = 2 * 2 * TB * dim * itemsize  # 2 inputs x 2 pipeline buffers
    tk_budget = max(128, (input_budget // per_lane) // 128 * 128)
    tk_cap = min(tk_budget, 8192)
    if HW <= tk_cap:
        TK, num_k = HW, 1
    else:
        TK = tk_cap                          # multiple of 128
        num_k = -(-HW // TK)
    lane_path = (TK % 128 == 0)

    kernel = _make_kernel(HW, TK, num_k, lane_path)
    scratch = ([pltpu.VMEM((TB, dim, 128), jnp.float32)] * 4) if lane_path else []

    cost = pl.CostEstimate(
        flops=int(2 * B * dim * HW
                  + 2 * B * (4 * dim * hidden_p + hidden_p * out2_p)),
        transcendentals=int(B * out2_p),
        bytes_accessed=int(2 * B * dim * HW * itemsize
                           + 4 * (w1p.size + b1p.size + w2p.size + b2p.size)
                           + 4 * B * out2_p),
    )

    y = pl.pallas_call(
        kernel,
        out_shape=jax.ShapeDtypeStruct((B, 1, out2_p), jnp.float32),
        grid_spec=pltpu.PrefetchScalarGridSpec(
            num_scalar_prefetch=0,
            grid=(B // TB, num_k),
            in_specs=[
                pl.BlockSpec((TB, dim, TK), lambda b, k: (b, 0, k)),
                pl.BlockSpec((TB, dim, TK), lambda b, k: (b, 0, k)),
                pl.BlockSpec((4, dim, hidden_p), lambda b, k: (0, 0, 0)),
                pl.BlockSpec((1, hidden_p), lambda b, k: (0, 0)),
                pl.BlockSpec((hidden_p, out2_p), lambda b, k: (0, 0)),
                pl.BlockSpec((1, out2_p), lambda b, k: (0, 0)),
            ],
            out_specs=pl.BlockSpec((TB, 1, out2_p), lambda b, k: (b, 0, 0)),
            scratch_shapes=scratch,
        ),
        compiler_params=pltpu.CompilerParams(
            dimension_semantics=("parallel", "arbitrary"),
            vmem_limit_bytes=int(usable),
        ),
        cost_estimate=cost,
    )(x1f, x2f, w1p, b1p, w2p, b2p)

    y = y[:, 0, :out2]                                    # (B, 2*dim)
    # y.view(B, 2*dim, 1) -> reshape(B, 2, dim, 1, 1) -> permute(1,0,2,3,4)
    return y.reshape(B, 2, dim, 1, 1).transpose(1, 0, 2, 3, 4)


def _reference(x1, x2, w1, b1, w2, b2, dim):
    """Pure-JAX reference matching the PyTorch forward."""
    B = x1.shape[0]
    x = jnp.concatenate([x1, x2], axis=1).astype(jnp.float32)
    avg = jnp.mean(x, axis=(2, 3))                       # (B, 2*dim)
    mx = jnp.max(x, axis=(2, 3))                         # (B, 2*dim)
    yy = jnp.concatenate([avg, mx], axis=1)              # (B, 4*dim)
    h = jnp.maximum(yy @ w1 + b1, 0.0)
    y = jax.nn.sigmoid(h @ w2 + b2)
    return y.reshape(B, 2, dim, 1, 1).transpose(1, 0, 2, 3, 4)


if __name__ == "__main__":
    def run_case(B, dim, H, W, reduction, dtype, seed, atol):
        hidden = (dim * 4) // reduction
        key = jax.random.PRNGKey(seed)
        k1, k2, kw1, kb1, kw2, kb2 = jax.random.split(key, 6)
        x1 = jax.random.normal(k1, (B, dim, H, W), jnp.float32).astype(dtype)
        x2 = jax.random.normal(k2, (B, dim, H, W), jnp.float32).astype(dtype)
        bound1 = 1.0 / (dim * 4) ** 0.5
        w1 = jax.random.uniform(kw1, (dim * 4, hidden), jnp.float32, -bound1, bound1)
        b1 = jax.random.uniform(kb1, (hidden,), jnp.float32, -bound1, bound1)
        bound2 = 1.0 / hidden ** 0.5
        w2 = jax.random.uniform(kw2, (hidden, dim * 2), jnp.float32, -bound2, bound2)
        b2 = jax.random.uniform(kb2, (dim * 2,), jnp.float32, -bound2, bound2)

        out = jax.block_until_ready(channel_weights(x1, x2, w1, b1, w2, b2, dim=dim))
        ref = _reference(x1, x2, w1, b1, w2, b2, dim)
        assert out.shape == (2, B, dim, 1, 1), out.shape
        err = float(jnp.max(jnp.abs(out - ref)))
        assert err <= atol, (B, dim, H, W, err)

    # Primary small case from the module spec (single spatial block, lane path).
    run_case(B=2, dim=4, H=16, W=16, reduction=1, dtype=jnp.float32, seed=0, atol=1e-5)
    # Exercises TB>1, bf16 streaming, multi-step spatial grid and the masked tail.
    run_case(B=4, dim=8, H=91, W=91, reduction=1, dtype=jnp.bfloat16, seed=0, atol=1e-4)
    # Exercises the single-block direct-reduction fallback (HW < 128) and odd B.
    run_case(B=3, dim=4, H=5, W=6, reduction=2, dtype=jnp.float32, seed=0, atol=1e-5)

    print("KERNEL_OK")
</pallas_src>

<mosaic_0001>
module attributes {stable_mosaic.version = 11 : i64} {
  func.func @kernel(%arg0: i32, %arg1: i32, %arg2: memref<1x4x256xf32, #tpu.memory_space<vmem>>, %arg3: memref<1x4x256xf32, #tpu.memory_space<vmem>>, %arg4: memref<4x4x128xf32, #tpu.memory_space<vmem>>, %arg5: memref<1x128xf32, #tpu.memory_space<vmem>>, %arg6: memref<128x128xf32, #tpu.memory_space<vmem>>, %arg7: memref<1x128xf32, #tpu.memory_space<vmem>>, %arg8: memref<1x1x128xf32, #tpu.memory_space<vmem>>, %arg9: memref<1x4x128xf32, #tpu.memory_space<vmem>>, %arg10: memref<1x4x128xf32, #tpu.memory_space<vmem>>, %arg11: memref<1x4x128xf32, #tpu.memory_space<vmem>>, %arg12: memref<1x4x128xf32, #tpu.memory_space<vmem>>) attributes {dimension_semantics = [#tpu.dimension_semantics<parallel>, #tpu.dimension_semantics<arbitrary>], iteration_bounds = array<i64: 2, 1>, scalar_prefetch = 0 : i64, scratch_operands = 4 : i64, tpu.core_type = #tpu.core_type<tc>, window_params = [{transform_indices = @transform_0, window_bounds = array<i64: 1, 4, 256>}, {transform_indices = @transform_1, window_bounds = array<i64: 1, 4, 256>}, {pipeline_mode = #tpu.pipeline_mode<synchronous>, transform_indices = @transform_2, window_bounds = array<i64: 4, 4, 128>}, {pipeline_mode = #tpu.pipeline_mode<synchronous>, transform_indices = @transform_3, window_bounds = array<i64: 1, 128>}, {pipeline_mode = #tpu.pipeline_mode<synchronous>, transform_indices = @transform_4, window_bounds = array<i64: 128, 128>}, {pipeline_mode = #tpu.pipeline_mode<synchronous>, transform_indices = @transform_5, window_bounds = array<i64: 1, 128>}, {transform_indices = @transform_6, window_bounds = array<i64: 1, 1, 128>}]} {
    %c0_i32 = arith.constant 0 : i32
    %0 = arith.cmpi eq, %arg1, %c0_i32 : i32
    %1 = arith.extui %0 : i1 to i32
    %c0_i32_0 = arith.constant 0 : i32
    %2 = arith.cmpi ne, %1, %c0_i32_0 : i32
    scf.if %2 {
      %cst = arith.constant 0.000000e+00 : f32
      %26 = vector.broadcast %cst : f32 to vector<1x4x128xf32>
      %c0_37 = arith.constant 0 : index
      %c0_38 = arith.constant 0 : index
      %c0_39 = arith.constant 0 : index
      %27 = vector.load %arg9[%c0_37, %c0_38, %c0_39] : memref<1x4x128xf32, #tpu.memory_space<vmem>>, vector<1x4x128xf32>
      tpu.vector_store %arg9[%c0_37, %c0_38, %c0_39], %26 {strides = array<i32>} : memref<1x4x128xf32, #tpu.memory_space<vmem>>, vector<1x4x128xf32>,
      %cst_40 = arith.constant 0.000000e+00 : f32
      %28 = vector.broadcast %cst_40 : f32 to vector<1x4x128xf32>
      %c0_41 = arith.constant 0 : index
      %c0_42 = arith.constant 0 : index
      %c0_43 = arith.constant 0 : index
      %29 = vector.load %arg10[%c0_41, %c0_42, %c0_43] : memref<1x4x128xf32, #tpu.memory_space<vmem>>, vector<1x4x128xf32>
      tpu.vector_store %arg10[%c0_41, %c0_42, %c0_43], %28 {strides = array<i32>} : memref<1x4x128xf32, #tpu.memory_space<vmem>>, vector<1x4x128xf32>,
      %cst_44 = arith.constant 0xFF800000 : f32
      %30 = vector.broadcast %cst_44 : f32 to vector<1x4x128xf32>
      %c0_45 = arith.constant 0 : index
      %c0_46 = arith.constant 0 : index
      %c0_47 = arith.constant 0 : index
      %31 = vector.load %arg11[%c0_45, %c0_46, %c0_47] : memref<1x4x128xf32, #tpu.memory_space<vmem>>, vector<1x4x128xf32>
      tpu.vector_store %arg11[%c0_45, %c0_46, %c0_47], %30 {strides = array<i32>} : memref<1x4x128xf32, #tpu.memory_space<vmem>>, vector<1x4x128xf32>,
      %cst_48 = arith.constant 0xFF800000 : f32
      %32 = vector.broadcast %cst_48 : f32 to vector<1x4x128xf32>
      %c0_49 = arith.constant 0 : index
      %c0_50 = arith.constant 0 : index
      %c0_51 = arith.constant 0 : index
      %33 = vector.load %arg12[%c0_49, %c0_50, %c0_51] : memref<1x4x128xf32, #tpu.memory_space<vmem>>, vector<1x4x128xf32>
      tpu.vector_store %arg12[%c0_49, %c0_50, %c0_51], %32 {strides = array<i32>} : memref<1x4x128xf32, #tpu.memory_space<vmem>>, vector<1x4x128xf32>,
    } else {
    }
    %c0 = arith.constant 0 : index
    %c0_1 = arith.constant 0 : index
    %c0_2 = arith.constant 0 : index
    %3 = vector.load %arg2[%c0, %c0_1, %c0_2] : memref<1x4x256xf32, #tpu.memory_space<vmem>>, vector<1x4x128xf32>
    %c0_3 = arith.constant 0 : index
    %c0_4 = arith.constant 0 : index
    %c0_5 = arith.constant 0 : index
    %4 = vector.load %arg3[%c0_3, %c0_4, %c0_5] : memref<1x4x256xf32, #tpu.memory_space<vmem>>, vector<1x4x128xf32>
    %c0_6 = arith.constant 0 : index
    %c0_7 = arith.constant 0 : index
    %c128 = arith.constant 128 : index
    %5 = vector.load %arg2[%c0_6, %c0_7, %c128] : memref<1x4x256xf32, #tpu.memory_space<vmem>>, vector<1x4x128xf32>
    %c0_8 = arith.constant 0 : index
    %c0_9 = arith.constant 0 : index
    %c128_10 = arith.constant 128 : index
    %6 = vector.load %arg3[%c0_8, %c0_9, %c128_10] : memref<1x4x256xf32, #tpu.memory_space<vmem>>, vector<1x4x128xf32>
    %c0_11 = arith.constant 0 : index
    %c0_12 = arith.constant 0 : index
    %c0_13 = arith.constant 0 : index
    %7 = vector.load %arg9[%c0_11, %c0_12, %c0_13] : memref<1x4x128xf32, #tpu.memory_space<vmem>>, vector<1x4x128xf32>
    %8 = arith.addf %3, %5 : vector<1x4x128xf32>
    %9 = arith.addf %7, %8 : vector<1x4x128xf32>
    %c0_14 = arith.constant 0 : index
    %c0_15 = arith.constant 0 : index
    %c0_16 = arith.constant 0 : index
    %10 = vector.load %arg9[%c0_14, %c0_15, %c0_16] : memref<1x4x128xf32, #tpu.memory_space<vmem>>, vector<1x4x128xf32>
    tpu.vector_store %arg9[%c0_14, %c0_15, %c0_16], %9 {strides = array<i32>} : memref<1x4x128xf32, #tpu.memory_space<vmem>>, vector<1x4x128xf32>,
    %c0_17 = arith.constant 0 : index
    %c0_18 = arith.constant 0 : index
    %c0_19 = arith.constant 0 : index
    %11 = vector.load %arg10[%c0_17, %c0_18, %c0_19] : memref<1x4x128xf32, #tpu.memory_space<vmem>>, vector<1x4x128xf32>
    %12 = arith.addf %4, %6 : vector<1x4x128xf32>
    %13 = arith.addf %11, %12 : vector<1x4x128xf32>
    %c0_20 = arith.constant 0 : index
    %c0_21 = arith.constant 0 : index
    %c0_22 = arith.constant 0 : index
    %14 = vector.load %arg10[%c0_20, %c0_21, %c0_22] : memref<1x4x128xf32, #tpu.memory_space<vmem>>, vector<1x4x128xf32>
    tpu.vector_store %arg10[%c0_20, %c0_21, %c0_22], %13 {strides = array<i32>} : memref<1x4x128xf32, #tpu.memory_space<vmem>>, vector<1x4x128xf32>,
    %c0_23 = arith.constant 0 : index
    %c0_24 = arith.constant 0 : index
    %c0_25 = arith.constant 0 : index
    %15 = vector.load %arg11[%c0_23, %c0_24, %c0_25] : memref<1x4x128xf32, #tpu.memory_space<vmem>>, vector<1x4x128xf32>
    %16 = arith.maximumf %3, %5 : vector<1x4x128xf32>
    %17 = arith.maximumf %15, %16 : vector<1x4x128xf32>
    %c0_26 = arith.constant 0 : index
    %c0_27 = arith.constant 0 : index
    %c0_28 = arith.constant 0 : index
    %18 = vector.load %arg11[%c0_26, %c0_27, %c0_28] : memref<1x4x128xf32, #tpu.memory_space<vmem>>, vector<1x4x128xf32>
    tpu.vector_store %arg11[%c0_26, %c0_27, %c0_28], %17 {strides = array<i32>} : memref<1x4x128xf32, #tpu.memory_space<vmem>>, vector<1x4x128xf32>,
    %c0_29 = arith.constant 0 : index
    %c0_30 = arith.constant 0 : index
    %c0_31 = arith.constant 0 : index
    %19 = vector.load %arg12[%c0_29, %c0_30, %c0_31] : memref<1x4x128xf32, #tpu.memory_space<vmem>>, vector<1x4x128xf32>
    %20 = arith.maximumf %4, %6 : vector<1x4x128xf32>
    %21 = arith.maximumf %19, %20 : vector<1x4x128xf32>
    %c0_32 = arith.constant 0 : index
    %c0_33 = arith.constant 0 : index
    %c0_34 = arith.constant 0 : index
    %22 = vector.load %arg12[%c0_32, %c0_33, %c0_34] : memref<1x4x128xf32, #tpu.memory_space<vmem>>, vector<1x4x128xf32>
    tpu.vector_store %arg12[%c0_32, %c0_33, %c0_34], %21 {strides = array<i32>} : memref<1x4x128xf32, #tpu.memory_space<vmem>>, vector<1x4x128xf32>,
    %c0_i32_35 = arith.constant 0 : i32
    %23 = arith.cmpi eq, %arg1, %c0_i32_35 : i32
    %24 = arith.extui %23 : i1 to i32
    %c0_i32_36 = arith.constant 0 : i32
    %25 = arith.cmpi ne, %24, %c0_i32_36 : i32
    scf.if %25 {
      %c0_37 = arith.constant 0 : index
      %c0_38 = arith.constant 0 : index
      %c0_39 = arith.constant 0 : index
      %26 = vector.load %arg9[%c0_37, %c0_38, %c0_39] : memref<1x4x128xf32, #tpu.memory_space<vmem>>, vector<1x4x128xf32>
      %cst = arith.constant dense<0.000000e+00> : vector<1x4xf32>
      %27 = vector.multi_reduction <add>, %26, %cst [2] : vector<1x4x128xf32> to vector<1x4xf32>
      %cst_40 = arith.constant 3.906250e-03 : f32
      %28 = vector.broadcast %cst_40 : f32 to vector<1x4xf32>
      %29 = arith.mulf %27, %28 : vector<1x4xf32>
      %c0_41 = arith.constant 0 : index
      %c0_42 = arith.constant 0 : index
      %c0_43 = arith.constant 0 : index
      %30 = vector.load %arg10[%c0_41, %c0_42, %c0_43] : memref<1x4x128xf32, #tpu.memory_space<vmem>>, vector<1x4x128xf32>
      %cst_44 = arith.constant dense<0.000000e+00> : vector<1x4xf32>
      %31 = vector.multi_reduction <add>, %30, %cst_44 [2] : vector<1x4x128xf32> to vector<1x4xf32>
      %cst_45 = arith.constant 3.906250e-03 : f32
      %32 = vector.broadcast %cst_45 : f32 to vector<1x4xf32>
      %33 = arith.mulf %31, %32 : vector<1x4xf32>
      %c0_46 = arith.constant 0 : index
      %c0_47 = arith.constant 0 : index
      %c0_48 = arith.constant 0 : index
      %34 = vector.load %arg11[%c0_46, %c0_47, %c0_48] : memref<1x4x128xf32, #tpu.memory_space<vmem>>, vector<1x4x128xf32>
      %cst_49 = arith.constant dense<0xFF800000> : vector<1x4xf32>
      %35 = vector.multi_reduction <maximumf>, %34, %cst_49 [2] : vector<1x4x128xf32> to vector<1x4xf32>
      %c0_50 = arith.constant 0 : index
      %c0_51 = arith.constant 0 : index
      %c0_52 = arith.constant 0 : index
      %36 = vector.load %arg12[%c0_50, %c0_51, %c0_52] : memref<1x4x128xf32, #tpu.memory_space<vmem>>, vector<1x4x128xf32>
      %cst_53 = arith.constant dense<0xFF800000> : vector<1x4xf32>
      %37 = vector.multi_reduction <maximumf>, %36, %cst_53 [2] : vector<1x4x128xf32> to vector<1x4xf32>
      %c0_54 = arith.constant 0 : index
      %c0_55 = arith.constant 0 : index
      %c0_56 = arith.constant 0 : index
      %38 = vector.load %arg4[%c0_54, %c0_55, %c0_56] : memref<4x4x128xf32, #tpu.memory_space<vmem>>, vector<1x4x128xf32>
      %39 = vector.shape_cast %38 : vector<1x4x128xf32> to vector<4x128xf32>
      %cst_57 = arith.constant dense<0.000000e+00> : vector<1x128xf32>
      %40 = tpu.matmul %29, %39, %cst_57 {dimension_numbers = #tpu.dot_dimension_numbers<[1], [0], [0], [1], [0, 0, 1, 1], [], []>} : vector<1x4xf32>, vector<4x128xf32>, vector<1x128xf32> -> vector<1x128xf32>
      %c1 = arith.constant 1 : index
      %c0_58 = arith.constant 0 : index
      %c0_59 = arith.constant 0 : index
      %41 = vector.load %arg4[%c1, %c0_58, %c0_59] : memref<4x4x128xf32, #tpu.memory_space<vmem>>, vector<1x4x128xf32>
      %42 = vector.shape_cast %41 : vector<1x4x128xf32> to vector<4x128xf32>
      %cst_60 = arith.constant dense<0.000000e+00> : vector<1x128xf32>
      %43 = tpu.matmul %33, %42, %cst_60 {dimension_numbers = #tpu.dot_dimension_numbers<[1], [0], [0], [1], [0, 0, 1, 1], [], []>} : vector<1x4xf32>, vector<4x128xf32>, vector<1x128xf32> -> vector<1x128xf32>
      %44 = arith.addf %40, %43 : vector<1x128xf32>
      %c2 = arith.constant 2 : index
      %c0_61 = arith.constant 0 : index
      %c0_62 = arith.constant 0 : index
      %45 = vector.load %arg4[%c2, %c0_61, %c0_62] : memref<4x4x128xf32, #tpu.memory_space<vmem>>, vector<1x4x128xf32>
      %46 = vector.shape_cast %45 : vector<1x4x128xf32> to vector<4x128xf32>
      %cst_63 = arith.constant dense<0.000000e+00> : vector<1x128xf32>
      %47 = tpu.matmul %35, %46, %cst_63 {dimension_numbers = #tpu.dot_dimension_numbers<[1], [0], [0], [1], [0, 0, 1, 1], [], []>} : vector<1x4xf32>, vector<4x128xf32>, vector<1x128xf32> -> vector<1x128xf32>
      %48 = arith.addf %44, %47 : vector<1x128xf32>
      %c3 = arith.constant 3 : index
      %c0_64 = arith.constant 0 : index
      %c0_65 = arith.constant 0 : index
      %49 = vector.load %arg4[%c3, %c0_64, %c0_65] : memref<4x4x128xf32, #tpu.memory_space<vmem>>, vector<1x4x128xf32>
      %50 = vector.shape_cast %49 : vector<1x4x128xf32> to vector<4x128xf32>
      %cst_66 = arith.constant dense<0.000000e+00> : vector<1x128xf32>
      %51 = tpu.matmul %37, %50, %cst_66 {dimension_numbers = #tpu.dot_dimension_numbers<[1], [0], [0], [1], [0, 0, 1, 1], [], []>} : vector<1x4xf32>, vector<4x128xf32>, vector<1x128xf32> -> vector<1x128xf32>
      %52 = arith.addf %48, %51 : vector<1x128xf32>
      %c0_67 = arith.constant 0 : index
      %c0_68 = arith.constant 0 : index
      %53 = vector.load %arg5[%c0_67, %c0_68] : memref<1x128xf32, #tpu.memory_space<vmem>>, vector<1x128xf32>
      %54 = arith.addf %52, %53 : vector<1x128xf32>
      %cst_69 = arith.constant 0.000000e+00 : f32
      %55 = vector.broadcast %cst_69 : f32 to vector<1x128xf32>
      %56 = arith.maximumf %54, %55 : vector<1x128xf32>
      %c0_70 = arith.constant 0 : index
      %c0_71 = arith.constant 0 : index
      %57 = vector.load %arg6[%c0_70, %c0_71] : memref<128x128xf32, #tpu.memory_space<vmem>>, vector<128x128xf32>
      %cst_72 = arith.constant dense<0.000000e+00> : vector<1x128xf32>
      %58 = tpu.matmul %56, %57, %cst_72 {dimension_numbers = #tpu.dot_dimension_numbers<[1], [0], [0], [1], [0, 0, 1, 1], [], []>} : vector<1x128xf32>, vector<128x128xf32>, vector<1x128xf32> -> vector<1x128xf32>
      %c0_73 = arith.constant 0 : index
      %c0_74 = arith.constant 0 : index
      %59 = vector.load %arg7[%c0_73, %c0_74] : memref<1x128xf32, #tpu.memory_space<vmem>>, vector<1x128xf32>
      %60 = arith.addf %58, %59 : vector<1x128xf32>
      %61 = arith.negf %60 : vector<1x128xf32>
      %62 = math.exp %61 : vector<1x128xf32>
      %cst_75 = arith.constant 1.000000e+00 : f32
      %63 = vector.broadcast %cst_75 : f32 to vector<1x128xf32>
      %64 = arith.addf %63, %62 : vector<1x128xf32>
      %65 = arith.divf %63, %64 : vector<1x128xf32>
      %66 = vector.shape_cast %65 : vector<1x128xf32> to vector<1x1x128xf32>
      %c0_76 = arith.constant 0 : index
      %c0_77 = arith.constant 0 : index
      %c0_78 = arith.constant 0 : index
      %67 = vector.load %arg8[%c0_76, %c0_77, %c0_78] : memref<1x1x128xf32, #tpu.memory_space<vmem>>, vector<1x1x128xf32>
      tpu.vector_store %arg8[%c0_76, %c0_77, %c0_78], %66 {strides = array<i32>} : memref<1x1x128xf32, #tpu.memory_space<vmem>>, vector<1x1x128xf32>,
    } else {
    }
    return
  }
  func.func @transform_0(%arg0: i32, %arg1: i32) -> (i32, i32, i32) {
    %c0_i32 = arith.constant 0 : i32
    %c0_i32_0 = arith.constant 0 : i32
    return %arg0, %c0_i32, %arg1 : i32, i32, i32
  }
  func.func @transform_1(%arg0: i32, %arg1: i32) -> (i32, i32, i32) {
    %c0_i32 = arith.constant 0 : i32
    %c0_i32_0 = arith.constant 0 : i32
    return %arg0, %c0_i32, %arg1 : i32, i32, i32
  }
  func.func @transform_2(%arg0: i32, %arg1: i32) -> (i32, i32, i32) {
    %c0_i32 = arith.constant 0 : i32
    %c0_i32_0 = arith.constant 0 : i32
    %c0_i32_1 = arith.constant 0 : i32
    %c0_i32_2 = arith.constant 0 : i32
    return %c0_i32, %c0_i32_0, %c0_i32_1 : i32, i32, i32
  }
  func.func @transform_3(%arg0: i32, %arg1: i32) -> (i32, i32) {
    %c0_i32 = arith.constant 0 : i32
    %c0_i32_0 = arith.constant 0 : i32
    %c0_i32_1 = arith.constant 0 : i32
    return %c0_i32, %c0_i32_0 : i32, i32
  }
  func.func @transform_4(%arg0: i32, %arg1: i32) -> (i32, i32) {
    %c0_i32 = arith.constant 0 : i32
    %c0_i32_0 = arith.constant 0 : i32
    %c0_i32_1 = arith.constant 0 : i32
    return %c0_i32, %c0_i32_0 : i32, i32
  }
  func.func @transform_5(%arg0: i32, %arg1: i32) -> (i32, i32) {
    %c0_i32 = arith.constant 0 : i32
    %c0_i32_0 = arith.constant 0 : i32
    %c0_i32_1 = arith.constant 0 : i32
    return %c0_i32, %c0_i32_0 : i32, i32
  }
  func.func @transform_6(%arg0: i32, %arg1: i32) -> (i32, i32, i32) {
    %c0_i32 = arith.constant 0 : i32
    %c0_i32_0 = arith.constant 0 : i32
    %c0_i32_1 = arith.constant 0 : i32
    return %arg0, %c0_i32, %c0_i32_0 : i32, i32, i32
  }
}

</mosaic_0001>

<bundles_post_ra>
// kernel: squeeze.1
= control target key start
LH: loop header
LB: loop body
LE: loop exit
PB: predicated region body
PF: predicated region fallthrough
CT: control target
= control target key end

     0   :  { %vm7_vm0 = vcmask 31744   ;;  %s49_s0 = inlined_call_operand.vmem [shape: f32[2,8], index: 0, kind: input, shape index: {}]   ;;  %s50_s1 = inlined_call_operand.vmem [shape: f32[2,2,4,1,1], index: 1, kind: output, shape index: {}]  }
   0x1   :  { %v4_v0 = vld [vmem:[%s49_s0] sm:$0x3]  ;;  %s29_s0 = smov 124  }
   0x2   :  { %5 = vst [vmem:[#allocation1] sm:$0x3] %v4_v0 }
   0x9   :  { %v9_v1 = vld [vmem:[#allocation1] sm:$0x3]  }
   0xa   :  { %v6_v2 = vld [vmem:[#allocation1] sm:$0x3]   ;;  %10 = vrot.lane.b32.xlu0 %v9_v1, %s29_s0 }
   0xb   :  { %8 = vst.msk [vmem:[#allocation0] ss:$8 sm:$0x3] %vm7_vm0, %v6_v2  }
  0x7c   :  { %v11_v3 = vpop.permute.xlu0 %10  }
  0x7d   :  { %14 = vst.msk [vmem:[#allocation0 + $0x1] ss:$8 sm:$0x3] %vm7_vm0, %v11_v3  }
  0x84   :  { %v17_v4 = vld [vmem:[#allocation0] sm:$0x3]  ;;  %v22_v5 = vld [vmem:[#allocation0 + $0x8] sm:$0x3] }
  0x85   :  { %20 = vst [vmem:[%s50_s1] sm:$0x3] %v17_v4 }
  0x86   :  { %27 = vst [vmem:[%s50_s1 + $0x2] sm:$0x3] %v22_v5 }

// kernel: channel_weights.1
= control target key start
LH: loop header
LB: loop body
LE: loop exit
PB: predicated region body
PF: predicated region fallthrough
CT: control target
= control target key end

     0   :  { %s737_s21 = smov 0   ;;  %s739_s22 = smov 0   ;;  %s851_s0 = inlined_call_operand.vmem [shape: f32[2,4,256], index: 0, kind: input, shape index: {}]   ;;  %s852_s1 = inlined_call_operand.vmem [shape: f32[2,4,256], index: 1, kind: input, shape index: {}]   ;;  %s853_s2 = inlined_call_operand.vmem [shape: f32[4,4,128], index: 2, kind: input, shape index: {}]   ;;  %s854_s3 = inlined_call_operand.vmem [shape: f32[1,128], index: 3, kind: input, shape index: {}]   ;;  %s855_s4 = inlined_call_operand.vmem [shape: f32[128,128], index: 4, kind: input, shape index: {}]   ;;  %s856_s5 = inlined_call_operand.vmem [shape: f32[1,128], index: 5, kind: input, shape index: {}]   ;;  %s857_s6 = inlined_call_operand.vmem [shape: f32[2,1,128], index: 6, kind: output, shape index: {}]  }
   0x1   :  { %s741_s23 = smov 0  }
   0x2 LB: > { %s28_s24 = sadd.s32 1, %s694_s22  ;;  %p625_p0 = scmp.ge.s32.totalorder %s698_s23, 1  ;;  %s698_s23 = sphi %s741_s23, %s16_s23   ;;  %s694_s22 = sphi %s739_s22, %s859_s22   ;;  %s690_s21 = sphi %s737_s21, %s858_s21  }
   0x3   : > { %p30_p1 = scmp.ge.s32.totalorder %s28_s24, 2  ;;  %p248_p2 = scmp.lt.s32.totalorder %s698_s23, 3 }
   0x5   : > { %s861_s24 = smov (%p30_p1, %s28_s24), 0  ;;  %p249_p3 = pnand %p625_p0, %p248_p2 }
   0x6   : > { %p290_p4 = scmp.lt.s32.totalorder (!%p249_p3), %s690_s21, 1 }
   0x7   : > { %252 = sbr.rel (%p249_p3) target bundleno = 455 (0x1c7), region = 44 }
   0xc   : > { %v700_v0 = vmov 0.0   ;;  %s863_s21 = smov (!%p290_p4, %s690_s21), 1  ;;  %v701_v1 = vmov -inf   ;;  %vm344_vm0 = vcmask 1043456   ;;  %v630_v26 = vld [vmem:[%s853_s2 + $0x4] sm:$0xf]  ;;  %v366_v35 = vlaneseq }
   0xd   : > { %317 = vst [vmem:[#allocation3] sm:$0xf] %v700_v0  ;;  %s644_s25 = sshll.u32 %s863_s21, 3  ;;  %631 = vmatpush.msk.msra.mxu1 %vm344_vm0, %v630_v26  ;;  %v362_v27 = vld [vmem:[%s853_s2] sm:$0xf]  ;;  %v500_v30 = vld [vmem:[%s855_s4 + $0x78] sm:$0xff]  ;;  %s311_s14 = scalar_lea.vmem %s857_s6, %s863_s21 }
   0xe   : > { %316 = vst [vmem:[#allocation2] sm:$0xf] %v700_v0  ;;  %s307_s28 = scalar_lea.vmem %s852_s1, %s644_s25  ;;  %s297_s7 = scalar_lea.vmem %s851_s0, %s644_s25  ;;  %v635_v28 = vld [vmem:[%s853_s2 + $0x8] sm:$0xf]  ;;  %v638_v29 = vld [vmem:[%s853_s2 + $0xc] sm:$0xf]  ;;  %502 = vmatpush.msra.mxu0 %v500_v30 }
   0xf   : > { %318 = vst [vmem:[#allocation4] sm:$0xf] %v701_v1  ;;  %v321_v2 = vld [vmem:[%s307_s28] sm:$0xf]  ;;  %v323_v3 = vld [vmem:[%s307_s28 + $0x4] sm:$0xf]  ;;  %633 = vmatpush.msk.msrb.mxu1 %vm344_vm0, %v362_v27  ;;  %636 = vmatpush.msk.msra.mxu2 %vm344_vm0, %v635_v28 }
  0x10   : > { %319 = vst [vmem:[#allocation5] sm:$0xf] %v701_v1  ;;  %v320_v4 = vld [vmem:[%s297_s7] sm:$0xf]  ;;  %v329_v5 = vadd.f32 %v323_v3, %v321_v2  ;;  %v322_v6 = vld [vmem:[%s297_s7 + $0x4] sm:$0xf]  ;;  %v337_v10 = vmax.f32 %v321_v2, %v323_v3  ;;  %639 = vmatpush.msk.msra.mxu3 %vm344_vm0, %v638_v29 }
  0x11   : > { %v325_v8 = vadd.f32 %v322_v6, %v320_v4  ;;  %v333_v9 = vmax.f32 %v320_v4, %v322_v6  ;;  %v499_v31 = vld [vmem:[%s855_s4 + $0x70] sm:$0xff]  ;;  %v498_v32 = vld [vmem:[%s855_s4 + $0x68] sm:$0xff]  ;;  %v497_v33 = vld [vmem:[%s855_s4 + $0x60] sm:$0xff]  ;;  %v367_v36 = vand.u32 127, %v366_v35  ;;  %vm369_vm1 = vcmask 31744  }
  0x12   : > { %503 = vmatpush.msra.mxu0 %v499_v31  ;;  %v496_v34 = vld [vmem:[%s855_s4 + $0x58] sm:$0xff]  ;;  %v495_v47 = vld [vmem:[%s855_s4 + $0x50] sm:$0xff]  ;;  %v494_v48 = vld [vmem:[%s855_s4 + $0x48] sm:$0xff] }
  0x13   : > { %v493_v49 = vld [vmem:[%s855_s4 + $0x40] sm:$0xff]  ;;  %v492_v50 = vld [vmem:[%s855_s4 + $0x38] sm:$0xff]  ;;  %v491_v51 = vld [vmem:[%s855_s4 + $0x30] sm:$0xff] }
  0x14   : > { %v328_v7 = vld [vmem:[#allocation3] sm:$0xf]  ;;  %504 = vmatpush.msra.mxu0 %v498_v32  ;;  %v490_v52 = vld [vmem:[%s855_s4 + $0x28] sm:$0xff]  ;;  %v488_v54 = vld [vmem:[%s855_s4 + $0x18] sm:$0xff] }
  0x15   : > { %v330_v11 = vadd.f32 %v329_v5, %v328_v7  ;;  %v324_v12 = vld [vmem:[#allocation2] sm:$0xf]  ;;  %v487_v55 = vld [vmem:[%s855_s4 + $0x10] sm:$0xff]  ;;  %v486_v56 = vld [vmem:[%s855_s4 + $0x8] sm:$0xff] }
  0x16   : > { %v326_v13 = vadd.f32 %v325_v8, %v324_v12  ;;  %v332_v14 = vld [vmem:[#allocation4] sm:$0xf]  ;;  %505 = vmatpush.msra.mxu0 %v497_v33  ;;  %v489_v53 = vld [vmem:[%s855_s4 + $0x20] sm:$0xff] }
  0x17   : > { %331 = vst [vmem:[#allocation3] sm:$0xf] %v330_v11  ;;  %v334_v15 = vmax.f32 %v332_v14, %v333_v9  ;;  %v336_v16 = vld [vmem:[#allocation5] sm:$0xf]  ;;  %v485_v57 = vld [vmem:[%s855_s4] sm:$0xff] }
  0x18   : > { %327 = vst [vmem:[#allocation2] sm:$0xf] %v326_v13  ;;  %v338_v17 = vmax.f32 %v336_v16, %v337_v10  ;;  %506 = vmatpush.msra.mxu0 %v496_v34  ;;  %v482_v0 = vld [vmem:[%s854_s3] sm:$0x1] }
  0x19   : > { %335 = vst [vmem:[#allocation4] sm:$0xf] %v334_v15  ;;  %v501_v4 = vld [vmem:[%s856_s5] sm:$0x1] }
  0x1a   : > { %339 = vst [vmem:[#allocation5] sm:$0xf] %v338_v17  ;;  %507 = vmatpush.msra.mxu0 %v495_v47 }
  0x1c   : > { %508 = vmatpush.msra.mxu0 %v494_v48 }
  0x1e   : > { %v349_v18 = vld [vmem:[#allocation3] sm:$0xf]  ;;  %509 = vmatpush.msra.mxu0 %v493_v49 }
  0x1f   : > { %v350_v19 = vsel %vm344_vm0, %v349_v18, 0.0  ;;  %v343_v20 = vld [vmem:[#allocation2] sm:$0xf] }
  0x20   : > { %351 = vadd.xlane.f32.xlu0 %v350_v19  ;;  %v345_v21 = vsel %vm344_vm0, %v343_v20, 0.0  ;;  %v354_v22 = vld [vmem:[#allocation4] sm:$0xf]  ;;  %510 = vmatpush.msra.mxu0 %v492_v50 }
  0x21   : > { %346 = vadd.xlane.f32.xlu1 %v345_v21  ;;  %v358_v23 = vld [vmem:[#allocation5] sm:$0xf]  ;;  %v355_v24 = vsel %vm344_vm0, %v354_v22, -inf }
  0x22   : > { %v359_v25 = vsel %vm344_vm0, %v358_v23, -inf  ;;  %511 = vmatpush.msra.mxu0 %v491_v51 }
  0x24   : > { %512 = vmatpush.msra.mxu0 %v490_v52 }
  0x26   : > { %513 = vmatpush.msra.mxu0 %v489_v53 }
  0x28   : > { %356 = vmax.xlane.f32.xlu0 %v355_v24  ;;  %514 = vmatpush.msra.mxu0 %v488_v54 }
  0x29   : > { %360 = vmax.xlane.f32.xlu1 %v359_v25 }
  0x2a   : > { %515 = vmatpush.msra.mxu0 %v487_v55 }
  0x2c   : > { %516 = vmatpush.msra.mxu0 %v486_v56 }
  0x2e   : > { %517 = vmatpush.msra.mxu0 %v485_v57 }
  0x93   : > { %v352_v37 = vpop.xlane.xlu0 %351 }
  0x94   : > { %v353_v38 = vmul.f32 0.00390625, %v352_v37  ;;  %v347_v39 = vpop.xlane.xlu1 %346 }
  0x95   : > { %v348_v41 = vmul.f32 0.00390625, %v347_v39 }
  0x96   : > { %v368_v40 = vperm.slane %v353_v38, %v367_v36 }
  0x97   : > { %v396_v46 = vperm.slane %v348_v41, %v367_v36 }
  0x98   : > { %632 = vmatmul.msk.f32.vlgmr.msra.gmra.mxu1 %vm369_vm1, %v368_v40 }
  0x9b   : > { %v357_v42 = vpop.xlane.xlu0 %356 }
  0x9c   : > { %v425_v43 = vperm.slane %v357_v42, %v367_v36  ;;  %v361_v44 = vpop.xlane.xlu1 %360 }
  0x9d   : > { %v455_v45 = vperm.slane %v361_v44, %v367_v36 }
  0x9e   : > { %637 = vmatmul.msk.f32.vlgmr.msra.gmra.mxu2 %vm369_vm1, %v425_v43 }
  0x9f   : > { %640 = vmatmul.msk.f32.vlgmr.msra.gmra.mxu3 %vm369_vm1, %v455_v45 }
  0xa0   : > { %634 = vmatmul.msk.f32.vlgmr.msrb.gmra.mxu1 %vm369_vm1, %v396_v46 }
 0x115   : > { %v392_v58 = vpop.f32.mrf.mxu1 }
 0x11d   : > { %v419_v59 = vpop.f32.mrf.mxu1 }
 0x11e   : > { %v420_v60 = vadd.f32 %v419_v59, %v392_v58 }
 0x121   : > { %v448_v61 = vpop.f32.mrf.mxu2 }
 0x122   : > { %v451_v62 = vadd.f32 %v448_v61, %v420_v60  ;;  %v478_v63 = vpop.f32.mrf.mxu3 }
 0x124   : > { %v481_v1 = vadd.f32 %v478_v63, %v451_v62 }
 0x126   : > { %v483_v2 = vadd.f32 %v482_v0, %v481_v1 }
 0x128   : > { %v484_v3 = vmax.f32 %v483_v2, 0.0 }
 0x12a   : > { %518 = vmatmul.f32.vlgmr.msra.gmra.mxu0 %v484_v3 }
 0x1a7   : > { %v519_v5 = vpop.f32.mrf.mxu0 }
 0x1a8   : > { %v520_v6 = vadd.f32 %v519_v5, %v501_v4 }
 0x1aa   : > { %v641_v7 = vmul.f32 -1.442695, %v520_v6 }
 0x1ac   : > { %672 = vpow2.f32 %v641_v7 }
 0x1b2   : > { %v673_v8 = vpop.eup %672 }
 0x1b3   : > { %v525_v9 = vadd.f32 1.0, %v673_v8 }
 0x1b5   : > { %674 = vrcp.f32 %v525_v9  ;;  %v537_v13 = vand.u32 2147483648, %v525_v9  ;;  %v535_v15 = vand.u32 2147483647, %v525_v9  ;;  %vm531_vm3 = vweird.f32 %v525_v9 }
 0x1b7   : > { %v538_v17 = vor.u32 1.1754944e-38, %v537_v13  ;;  %vm536_vm5 = vcmp.eq.f32.partialorder %v535_v15, 8.507059e+37 }
 0x1bb   : > { %v675_v10 = vpop.eup %674 }
 0x1bc   : > { %v527_v11 = vmul.f32 %v675_v10, %v525_v9  ;;  %vm532_vm2 = vweird.f32 %v675_v10 }
 0x1bd   : > { %vm533_vm4 = vmor %vm531_vm3, %vm532_vm2 }
 0x1be   : > { %v528_v12 = vsub.f32 1.0, %v527_v11 }
 0x1c0   : > { %v529_v14 = vmul.f32 %v675_v10, %v528_v12 }
 0x1c2   : > { %v530_v16 = vadd.f32 %v675_v10, %v529_v14 }
 0x1c4   : > { %v534_v18 = vsel %vm533_vm4, %v675_v10, %v530_v16 }
 0x1c5   : > { %v539_v19 = vsel %vm536_vm5, %v538_v17, %v534_v18 }
 0x1c6   : > { %541 = vst [vmem:[%s311_s14] sm:$0x1] %v539_v19 }
 0x1c7 PF: > { %s16_s23 = sadd.s32 1, %s698_s23   ;;  %s858_s21 = smov %s694_s22 }
 0x1c8   : > { %p13_p5 = scmp.ge.s32.totalorder %s16_s23, 4   ;;  %s859_s22 = smov %s861_s24 }
 0x1ca   :  { %15 = sbr.rel (!%p13_p5) target bundleno = 2 (0x2), region = 88 }

</bundles_post_ra>
